<compile_context>
chip_gen: v5e
topology: v5e:2x2
jax: 0.10.0
libtpu: 0.0.40
codegen_flags: <defaults>
</compile_context>

<pallas_src>
import functools

import jax
import jax.numpy as jnp
import numpy as np
from jax.experimental import pallas as pl
from jax.experimental.pallas import tpu as pltpu

LN_EPS = 1e-5  # PyTorch nn.LayerNorm default


def _ln(x, g, b):
    # Single-pass LN statistics: the two lane reduces (sum x, sum x^2) are independent,
    # so the XLU can pipeline them and we drop one full-width VPU subtract per LN.
    mu = jnp.mean(x, axis=-1, keepdims=True)
    ms = jnp.mean(x * x, axis=-1, keepdims=True)
    var = jnp.maximum(ms - mu * mu, 0.0)
    return (x - mu) * jax.lax.rsqrt(var + LN_EPS) * g + b


def _sigmoid(x):
    # Exact identity sigmoid(x) = 0.5*(1 + tanh(x/2)): one EUP op + cheap VPU per element.
    return 0.5 * jnp.tanh(0.5 * x) + 0.5


def critic_kernel(obs_ref, h_ref, mask_ref,
                  w1_ref, w2_ref, wg_ref, w3_ref, w4_ref,
                  pd_ref, ph_ref, pg_ref,
                  out_ref, *, inv_d):
    f32 = jnp.float32
    bf16 = jnp.bfloat16
    H = h_ref.shape[-1]

    def mm(a, w_ref):
        # bf16 operands -> MXU bf16 path, f32 accumulation.
        return jnp.dot(a.astype(bf16), w_ref[...], preferred_element_type=f32)

    def row(k):  # static (1, H) row slice of the packed parameter table
        return ph_ref[k:k + 1, :]

    def lin_relu_ln(x, w_ref, rb):  # rows rb, rb+1, rb+2 = bias, LN gain, LN beta
        y = jnp.maximum(mm(x, w_ref) + row(rb), 0.0)
        return _ln(y, row(rb + 1), row(rb + 2))

    # ---- masked input LayerNorm over the full (lane-aligned) obs tile ----
    # pd rows: 0 = 0/1 lane mask (lanes >= max_z), 1 = gamma (zeroed on masked lanes),
    # 2 = beta (zeroed on masked lanes). Statistics use only the D real lanes; masked
    # lanes come out exactly 0 and w1 has matching zero rows, so no lane slice is needed.
    obs = obs_ref[...]
    lmask = pd_ref[0:1, :]
    xm = obs * lmask
    mu = jnp.sum(xm, axis=-1, keepdims=True) * inv_d
    ms = jnp.sum(xm * xm, axis=-1, keepdims=True) * inv_d
    var = jnp.maximum(ms - mu * mu, 0.0)
    x = (obs - mu) * jax.lax.rsqrt(var + LN_EPS) * pd_ref[1:2, :] + pd_ref[2:3, :]

    # ---- base MLP ----
    x = lin_relu_ln(x, w1_ref, 0)
    x = lin_relu_ln(x, w2_ref, 3)

    # ---- GRU cell (recurrent_N = 1, single-step), ONE fused K=2H / N=4H matmul ----
    h = h_ref[...] * mask_ref[...]                     # (B,H) * (B,1)
    xc = jnp.concatenate([x, h], axis=-1)              # (B, 2H)
    g = mm(xc, wg_ref) + pg_ref[...]                   # (B, 4H): [r_pre | z_pre | gi_n | gh_n]
    r = _sigmoid(g[:, :H])
    z = _sigmoid(g[:, H:2 * H])
    n = jnp.tanh(g[:, 2 * H:3 * H] + r * g[:, 3 * H:])
    h_new = (1.0 - z) * n + z * h

    # ---- post-RNN LayerNorm + base2 MLP ----
    x = _ln(h_new, row(6), row(7))
    x = _ln(x, row(8), row(9))
    x = lin_relu_ln(x, w3_ref, 10)
    x = lin_relu_ln(x, w4_ref, 13)

    # ---- value head: VPU mul + lane reduce (a (B,H)@(H,1) matmul would feed 1 MXU col) ----
    val = jnp.sum(x * row(16), axis=-1, keepdims=True) + ph_ref[17:18, 0:1]

    # ---- lane-dense packed writeback: lanes [0,H) = h_new, lanes [H,2H) = value ----
    out_ref[...] = jnp.concatenate([h_new, jnp.broadcast_to(val, h_new.shape)], axis=-1)


def pack_params(p, max_z):
    """Pack the 36 PyTorch-style parameters into 8 kernel inputs:
    5 bf16 weight matrices (GRU gates fused to one (2H,4H)) + 3 small f32 tables."""
    bf16 = jnp.bfloat16
    f32 = jnp.float32
    D, H = p["w1"].shape                 # D = obs_dim - max_z
    zH = jnp.zeros((H, H), f32)

    # w1 padded with max_z zero rows: kernel consumes the full obs tile, no lane slice.
    w1p = jnp.concatenate([jnp.zeros((max_z, H), f32), p["w1"]], axis=0)

    # Fused GRU weight (2H, 4H): [[Wir, Wiz, Win, 0], [Whr, Whz, 0, Whn]].
    wg = jnp.concatenate([
        jnp.concatenate([p["wir"], p["wiz"], p["win"], zH], axis=1),
        jnp.concatenate([p["whr"], p["whz"], zH, p["whn"]], axis=1),
    ], axis=0)
    pg = jnp.concatenate([p["bir"] + p["bhr"], p["biz"] + p["bhz"],
                          p["bin"], p["bhn"]], axis=1).astype(f32)       # (1, 4H)

    # Input-LN table (3, obs_dim): lane mask, zero-padded gamma, zero-padded beta.
    pad = jnp.zeros((1, max_z), f32)
    pd = jnp.concatenate([
        jnp.concatenate([pad, jnp.ones((1, D), f32)], axis=1),
        jnp.concatenate([pad, p["fn0_g"]], axis=1),
        jnp.concatenate([pad, p["fn0_b"]], axis=1),
    ], axis=0)

    ph = jnp.concatenate([
        p["b1"], p["ln1_g"], p["ln1_b"],          # rows 0..2
        p["b2"], p["ln2_g"], p["ln2_b"],          # rows 3..5
        p["lnr_g"], p["lnr_b"],                   # rows 6..7   (post-GRU LN)
        p["fn2_g"], p["fn2_b"],                   # rows 8..9   (base2 feature LN)
        p["b3"], p["ln3_g"], p["ln3_b"],          # rows 10..12
        p["b4"], p["ln4_g"], p["ln4_b"],          # rows 13..15
        p["wv"].T,                                # row 16: value-head weights (VPU reduce)
        jnp.broadcast_to(p["bv"], (1, H)),        # row 17: value bias (read at [17, 0])
    ], axis=0).astype(f32)

    return dict(
        w1=w1p.astype(bf16), w2=p["w2"].astype(bf16), wg=wg.astype(bf16),
        w3=p["w3"].astype(bf16), w4=p["w4"].astype(bf16),
        pd=pd, ph=ph, pg=pg,
    )


def r_ex_critic_forward(packed, cent_obs, rnn_states, masks, max_z, tile_b=None):
    """Returns (values (B,1), rnn_states (B, 1, H))."""
    B, obs_dim = cent_obs.shape
    H = packed["w2"].shape[1]
    D = obs_dim - max_z
    cent_obs = cent_obs.astype(jnp.float32)          # full obs; max_z lanes masked in-kernel
    h0 = rnn_states[:, 0, :].astype(jnp.float32)     # recurrent_N == 1, single-step path
    masks = masks.astype(jnp.float32)

    # Batch tiling: aim for >= 2 grid steps (v7x has 2 TCs; "parallel" shards the batch
    # axis across them) while amortizing ~0.35us/step grid overhead with big tiles.
    # Cap at 2048 rows so double-buffered I/O tiles (mask/obs/h pad to 128 lanes) plus the
    # (TILE_B, 4H) gate temporaries stay inside the scoped VMEM budget on every generation.
    if tile_b is None:
        half = (((B + 1) // 2) + 7) // 8 * 8
        tile_b = max(8, min(2048, half))
    TILE_B = int(min(tile_b, ((B + 7) // 8) * 8))
    Bp = int(pl.cdiv(B, TILE_B)) * TILE_B
    if Bp != B:
        pad = ((0, Bp - B), (0, 0))
        cent_obs = jnp.pad(cent_obs, pad)
        h0 = jnp.pad(h0, pad)
        masks = jnp.pad(masks, pad)

    grid = (Bp // TILE_B,)

    def bspec(feat):          # batch-tiled activations / outputs
        return pl.BlockSpec((TILE_B, feat), lambda i: (i, 0))

    def wspec(arr):           # grid-invariant -> stays VMEM-resident, not re-DMA'd per tile
        return pl.BlockSpec(arr.shape, lambda i: (0, 0))

    weights = [packed[k] for k in ("w1", "w2", "wg", "w3", "w4", "pd", "ph", "pg")]

    cp = dict(dimension_semantics=("parallel",))      # shards batch tiles across v7x's 2 TCs
    if TILE_B > 1024:
        cp["vmem_limit_bytes"] = 48 * 1024 * 1024     # only raise when a big tile is used

    out = pl.pallas_call(
        functools.partial(critic_kernel, inv_d=1.0 / D),
        grid=grid,
        in_specs=[bspec(obs_dim), bspec(H), bspec(1)] + [wspec(w) for w in weights],
        out_specs=bspec(2 * H),
        out_shape=jax.ShapeDtypeStruct((Bp, 2 * H), jnp.float32),
        compiler_params=pltpu.CompilerParams(**cp),
    )(cent_obs, h0, masks, *weights)

    # Wrapper-side split of the lane-dense packed output (pure layout plumbing).
    values = out[:B, H:H + 1]
    h_out = out[:B, :H]
    return values, h_out[:, None, :]


def init_params(key, obs_dim, max_z, hidden):
    """Deterministic synthetic parameters (shapes match the module's __init__)."""
    D = obs_dim - max_z
    ks = iter(jax.random.split(key, 32))

    def lin(kw, kb, din, dout):
        w = (jax.random.normal(kw, (din, dout), jnp.float32) / np.sqrt(din)).astype(jnp.float32)
        b = (0.01 * jax.random.normal(kb, (1, dout), jnp.float32)).astype(jnp.float32)
        return w, b

    p = {}
    # base MLPBase on D
    p["fn0_g"], p["fn0_b"] = jnp.ones((1, D), jnp.float32), jnp.zeros((1, D), jnp.float32)
    p["w1"], p["b1"] = lin(next(ks), next(ks), D, hidden)
    p["ln1_g"], p["ln1_b"] = jnp.ones((1, hidden), jnp.float32), jnp.zeros((1, hidden), jnp.float32)
    p["w2"], p["b2"] = lin(next(ks), next(ks), hidden, hidden)
    p["ln2_g"], p["ln2_b"] = jnp.ones((1, hidden), jnp.float32), jnp.zeros((1, hidden), jnp.float32)
    # GRU (recurrent_N = 1)
    for name in ("wir", "wiz", "win", "whr", "whz", "whn"):
        p[name], _ = lin(next(ks), next(ks), hidden, hidden)
    for name in ("bir", "biz", "bin", "bhr", "bhz", "bhn"):
        p[name] = (0.01 * jax.random.normal(next(ks), (1, hidden), jnp.float32)).astype(jnp.float32)
    p["lnr_g"], p["lnr_b"] = jnp.ones((1, hidden), jnp.float32), jnp.zeros((1, hidden), jnp.float32)
    # base2 MLPBase on hidden
    p["fn2_g"], p["fn2_b"] = jnp.ones((1, hidden), jnp.float32), jnp.zeros((1, hidden), jnp.float32)
    p["w3"], p["b3"] = lin(next(ks), next(ks), hidden, hidden)
    p["ln3_g"], p["ln3_b"] = jnp.ones((1, hidden), jnp.float32), jnp.zeros((1, hidden), jnp.float32)
    p["w4"], p["b4"] = lin(next(ks), next(ks), hidden, hidden)
    p["ln4_g"], p["ln4_b"] = jnp.ones((1, hidden), jnp.float32), jnp.zeros((1, hidden), jnp.float32)
    # v_out
    p["wv"], p["bv"] = lin(next(ks), next(ks), hidden, 1)
    return p


def ref_forward(p, cent_obs, rnn_states, masks, max_z):
    """Pure-JAX reference with the module's semantics and the same numerics as the kernel:
    bf16 weights/activations into every matmul, f32 accumulation and f32 elementwise math.
    The bf16 weight quantization keeps results within ~1e-2 of the f32 PyTorch module."""
    bf16 = jnp.bfloat16

    def mm(a, w):
        return jnp.dot(a.astype(bf16), w.astype(bf16), preferred_element_type=jnp.float32)

    x = cent_obs[:, max_z:]
    x = _ln(x, p["fn0_g"], p["fn0_b"])
    x = _ln(jnp.maximum(mm(x, p["w1"]) + p["b1"], 0.0), p["ln1_g"], p["ln1_b"])
    x = _ln(jnp.maximum(mm(x, p["w2"]) + p["b2"], 0.0), p["ln2_g"], p["ln2_b"])
    h = rnn_states[:, 0, :] * masks
    r = jax.nn.sigmoid(mm(x, p["wir"]) + p["bir"] + mm(h, p["whr"]) + p["bhr"])
    z = jax.nn.sigmoid(mm(x, p["wiz"]) + p["biz"] + mm(h, p["whz"]) + p["bhz"])
    n = jnp.tanh(mm(x, p["win"]) + p["bin"] + r * (mm(h, p["whn"]) + p["bhn"]))
    h_new = (1.0 - z) * n + z * h
    x = _ln(h_new, p["lnr_g"], p["lnr_b"])
    x = _ln(x, p["fn2_g"], p["fn2_b"])
    x = _ln(jnp.maximum(mm(x, p["w3"]) + p["b3"], 0.0), p["ln3_g"], p["ln3_b"])
    x = _ln(jnp.maximum(mm(x, p["w4"]) + p["b4"], 0.0), p["ln4_g"], p["ln4_b"])
    v = jnp.sum(x * p["wv"].T, axis=-1, keepdims=True) + p["bv"]
    return v, h_new[:, None, :]


if __name__ == "__main__":
    # Small config consistent with the module: 1-D centralized obs -> MLPBase path.
    hidden, max_z, recurrent_N = 64, 4, 1
    obs_dim = 36  # cent_obs_shape[0]; base sees obs_dim - max_z = 32 features

    key = jax.random.PRNGKey(0)
    _, _, k_p = jax.random.split(key, 3)
    params = init_params(k_p, obs_dim, max_z, hidden)
    packed = pack_params(params, max_z)

    # Case 1: single small tile (default sizing). Case 2: multi-tile grid with a ragged
    # (padded) tail. Case 3: default tile derivation producing >= 2 grid steps.
    for batch, tile_b in ((8, None), (13, 8), (300, None)):
        ko, kh = jax.random.split(jax.random.fold_in(key, batch))
        cent_obs = jax.random.normal(ko, (batch, obs_dim), jnp.float32)
        rnn_states = jax.random.normal(kh, (batch, recurrent_N, hidden), jnp.float32)
        masks = jnp.ones((batch, 1), jnp.float32).at[0, 0].set(0.0)  # one episode reset

        values, new_states = r_ex_critic_forward(packed, cent_obs, rnn_states, masks,
                                                 max_z, tile_b=tile_b)
        values = jax.block_until_ready(values)
        new_states = jax.block_until_ready(new_states)

        v_ref, h_ref = ref_forward(params, cent_obs, rnn_states, masks, max_z)
        assert values.shape == (batch, 1)
        assert new_states.shape == (batch, recurrent_N, hidden)
        np.testing.assert_allclose(np.asarray(values), np.asarray(v_ref), rtol=1e-2, atol=1e-2)
        np.testing.assert_allclose(np.asarray(new_states), np.asarray(h_ref), rtol=1e-2, atol=1e-2)

    print("KERNEL_OK")
</pallas_src>

<mosaic_0001>
module attributes {stable_mosaic.version = 11 : i64} {
  func.func @critic_kernel(%arg0: i32, %arg1: memref<8x36xf32, #tpu.memory_space<vmem>>, %arg2: memref<8x64xf32, #tpu.memory_space<vmem>>, %arg3: memref<8x1xf32, #tpu.memory_space<vmem>>, %arg4: memref<36x64xbf16, #tpu.memory_space<vmem>>, %arg5: memref<64x64xbf16, #tpu.memory_space<vmem>>, %arg6: memref<128x256xbf16, #tpu.memory_space<vmem>>, %arg7: memref<64x64xbf16, #tpu.memory_space<vmem>>, %arg8: memref<64x64xbf16, #tpu.memory_space<vmem>>, %arg9: memref<3x36xf32, #tpu.memory_space<vmem>>, %arg10: memref<18x64xf32, #tpu.memory_space<vmem>>, %arg11: memref<1x256xf32, #tpu.memory_space<vmem>>, %arg12: memref<8x128xf32, #tpu.memory_space<vmem>>) attributes {dimension_semantics = [#tpu.dimension_semantics<parallel>], iteration_bounds = array<i64: 1>, scalar_prefetch = 0 : i64, scratch_operands = 0 : i64, tpu.core_type = #tpu.core_type<tc>, window_params = [{transform_indices = @transform_0, window_bounds = array<i64: 8, 36>}, {transform_indices = @transform_1, window_bounds = array<i64: 8, 64>}, {transform_indices = @transform_2, window_bounds = array<i64: 8, 1>}, {pipeline_mode = #tpu.pipeline_mode<synchronous>, transform_indices = @transform_3, window_bounds = array<i64: 36, 64>}, {pipeline_mode = #tpu.pipeline_mode<synchronous>, transform_indices = @transform_4, window_bounds = array<i64: 64, 64>}, {pipeline_mode = #tpu.pipeline_mode<synchronous>, transform_indices = @transform_5, window_bounds = array<i64: 128, 256>}, {pipeline_mode = #tpu.pipeline_mode<synchronous>, transform_indices = @transform_6, window_bounds = array<i64: 64, 64>}, {pipeline_mode = #tpu.pipeline_mode<synchronous>, transform_indices = @transform_7, window_bounds = array<i64: 64, 64>}, {pipeline_mode = #tpu.pipeline_mode<synchronous>, transform_indices = @transform_8, window_bounds = array<i64: 3, 36>}, {pipeline_mode = #tpu.pipeline_mode<synchronous>, transform_indices = @transform_9, window_bounds = array<i64: 18, 64>}, {pipeline_mode = #tpu.pipeline_mode<synchronous>, transform_indices = @transform_10, window_bounds = array<i64: 1, 256>}, {transform_indices = @transform_11, window_bounds = array<i64: 8, 128>}]} {
    %c0 = arith.constant 0 : index
    %c0_0 = arith.constant 0 : index
    %0 = vector.load %arg1[%c0, %c0_0] : memref<8x36xf32, #tpu.memory_space<vmem>>, vector<8x36xf32>
    %c0_1 = arith.constant 0 : index
    %c0_2 = arith.constant 0 : index
    %1 = vector.load %arg9[%c0_1, %c0_2] : memref<3x36xf32, #tpu.memory_space<vmem>>, vector<1x36xf32>
    %2 = vector.broadcast %1 : vector<1x36xf32> to vector<8x36xf32>
    %3 = arith.mulf %0, %2 : vector<8x36xf32>
    %cst = arith.constant dense<0.000000e+00> : vector<8xf32>
    %4 = vector.multi_reduction <add>, %3, %cst [1] : vector<8x36xf32> to vector<8xf32>
    %5 = vector.shape_cast %4 : vector<8xf32> to vector<8x1xf32>
    %cst_3 = arith.constant 3.125000e-02 : f32
    %6 = vector.broadcast %cst_3 : f32 to vector<8x1xf32>
    %7 = arith.mulf %5, %6 : vector<8x1xf32>
    %8 = arith.mulf %3, %3 : vector<8x36xf32>
    %cst_4 = arith.constant dense<0.000000e+00> : vector<8xf32>
    %9 = vector.multi_reduction <add>, %8, %cst_4 [1] : vector<8x36xf32> to vector<8xf32>
    %10 = vector.shape_cast %9 : vector<8xf32> to vector<8x1xf32>
    %cst_5 = arith.constant 3.125000e-02 : f32
    %11 = vector.broadcast %cst_5 : f32 to vector<8x1xf32>
    %12 = arith.mulf %10, %11 : vector<8x1xf32>
    %13 = arith.mulf %7, %7 : vector<8x1xf32>
    %14 = arith.subf %12, %13 : vector<8x1xf32>
    %cst_6 = arith.constant 0.000000e+00 : f32
    %15 = vector.broadcast %cst_6 : f32 to vector<8x1xf32>
    %16 = arith.maximumf %14, %15 : vector<8x1xf32>
    %17 = vector.broadcast %7 : vector<8x1xf32> to vector<8x36xf32>
    %18 = arith.subf %0, %17 : vector<8x36xf32>
    %cst_7 = arith.constant 9.99999974E-6 : f32
    %19 = vector.broadcast %cst_7 : f32 to vector<8x1xf32>
    %20 = arith.addf %16, %19 : vector<8x1xf32>
    %21 = math.rsqrt %20 : vector<8x1xf32>
    %22 = vector.broadcast %21 : vector<8x1xf32> to vector<8x36xf32>
    %23 = arith.mulf %18, %22 : vector<8x36xf32>
    %c1 = arith.constant 1 : index
    %c0_8 = arith.constant 0 : index
    %24 = vector.load %arg9[%c1, %c0_8] : memref<3x36xf32, #tpu.memory_space<vmem>>, vector<1x36xf32>
    %25 = vector.broadcast %24 : vector<1x36xf32> to vector<8x36xf32>
    %26 = arith.mulf %23, %25 : vector<8x36xf32>
    %c2 = arith.constant 2 : index
    %c0_9 = arith.constant 0 : index
    %27 = vector.load %arg9[%c2, %c0_9] : memref<3x36xf32, #tpu.memory_space<vmem>>, vector<1x36xf32>
    %28 = vector.broadcast %27 : vector<1x36xf32> to vector<8x36xf32>
    %29 = arith.addf %26, %28 : vector<8x36xf32>
    %30 = arith.truncf %29 : vector<8x36xf32> to vector<8x36xbf16>
    %c0_10 = arith.constant 0 : index
    %c0_11 = arith.constant 0 : index
    %31 = vector.load %arg4[%c0_10, %c0_11] : memref<36x64xbf16, #tpu.memory_space<vmem>>, vector<36x64xbf16>
    %cst_12 = arith.constant dense<0.000000e+00> : vector<8x64xf32>
    %32 = tpu.matmul %30, %31, %cst_12 {dimension_numbers = #tpu.dot_dimension_numbers<[1], [0], [0], [1], [0, 0, 1, 1], [], []>} : vector<8x36xbf16>, vector<36x64xbf16>, vector<8x64xf32> -> vector<8x64xf32>
    %c0_13 = arith.constant 0 : index
    %c0_14 = arith.constant 0 : index
    %33 = vector.load %arg10[%c0_13, %c0_14] : memref<18x64xf32, #tpu.memory_space<vmem>>, vector<1x64xf32>
    %34 = vector.broadcast %33 : vector<1x64xf32> to vector<8x64xf32>
    %35 = arith.addf %32, %34 : vector<8x64xf32>
    %cst_15 = arith.constant 0.000000e+00 : f32
    %36 = vector.broadcast %cst_15 : f32 to vector<8x64xf32>
    %37 = arith.maximumf %35, %36 : vector<8x64xf32>
    %c1_16 = arith.constant 1 : index
    %c0_17 = arith.constant 0 : index
    %38 = vector.load %arg10[%c1_16, %c0_17] : memref<18x64xf32, #tpu.memory_space<vmem>>, vector<1x64xf32>
    %c2_18 = arith.constant 2 : index
    %c0_19 = arith.constant 0 : index
    %39 = vector.load %arg10[%c2_18, %c0_19] : memref<18x64xf32, #tpu.memory_space<vmem>>, vector<1x64xf32>
    %cst_20 = arith.constant dense<0.000000e+00> : vector<8xf32>
    %40 = vector.multi_reduction <add>, %37, %cst_20 [1] : vector<8x64xf32> to vector<8xf32>
    %41 = vector.shape_cast %40 : vector<8xf32> to vector<8x1xf32>
    %cst_21 = arith.constant 6.400000e+01 : f32
    %42 = vector.broadcast %cst_21 : f32 to vector<8x1xf32>
    %43 = arith.divf %41, %42 : vector<8x1xf32>
    %44 = arith.mulf %37, %37 : vector<8x64xf32>
    %cst_22 = arith.constant dense<0.000000e+00> : vector<8xf32>
    %45 = vector.multi_reduction <add>, %44, %cst_22 [1] : vector<8x64xf32> to vector<8xf32>
    %46 = vector.shape_cast %45 : vector<8xf32> to vector<8x1xf32>
    %cst_23 = arith.constant 6.400000e+01 : f32
    %47 = vector.broadcast %cst_23 : f32 to vector<8x1xf32>
    %48 = arith.divf %46, %47 : vector<8x1xf32>
    %49 = arith.mulf %43, %43 : vector<8x1xf32>
    %50 = arith.subf %48, %49 : vector<8x1xf32>
    %cst_24 = arith.constant 0.000000e+00 : f32
    %51 = vector.broadcast %cst_24 : f32 to vector<8x1xf32>
    %52 = arith.maximumf %50, %51 : vector<8x1xf32>
    %53 = vector.broadcast %43 : vector<8x1xf32> to vector<8x64xf32>
    %54 = arith.subf %37, %53 : vector<8x64xf32>
    %cst_25 = arith.constant 9.99999974E-6 : f32
    %55 = vector.broadcast %cst_25 : f32 to vector<8x1xf32>
    %56 = arith.addf %52, %55 : vector<8x1xf32>
    %57 = math.rsqrt %56 : vector<8x1xf32>
    %58 = vector.broadcast %57 : vector<8x1xf32> to vector<8x64xf32>
    %59 = arith.mulf %54, %58 : vector<8x64xf32>
    %60 = vector.broadcast %38 : vector<1x64xf32> to vector<8x64xf32>
    %61 = arith.mulf %59, %60 : vector<8x64xf32>
    %62 = vector.broadcast %39 : vector<1x64xf32> to vector<8x64xf32>
    %63 = arith.addf %61, %62 : vector<8x64xf32>
    %64 = arith.truncf %63 : vector<8x64xf32> to vector<8x64xbf16>
    %c0_26 = arith.constant 0 : index
    %c0_27 = arith.constant 0 : index
    %65 = vector.load %arg5[%c0_26, %c0_27] : memref<64x64xbf16, #tpu.memory_space<vmem>>, vector<64x64xbf16>
    %cst_28 = arith.constant dense<0.000000e+00> : vector<8x64xf32>
    %66 = tpu.matmul %64, %65, %cst_28 {dimension_numbers = #tpu.dot_dimension_numbers<[1], [0], [0], [1], [0, 0, 1, 1], [], []>} : vector<8x64xbf16>, vector<64x64xbf16>, vector<8x64xf32> -> vector<8x64xf32>
    %c3 = arith.constant 3 : index
    %c0_29 = arith.constant 0 : index
    %67 = vector.load %arg10[%c3, %c0_29] : memref<18x64xf32, #tpu.memory_space<vmem>>, vector<1x64xf32>
    %68 = vector.broadcast %67 : vector<1x64xf32> to vector<8x64xf32>
    %69 = arith.addf %66, %68 : vector<8x64xf32>
    %cst_30 = arith.constant 0.000000e+00 : f32
    %70 = vector.broadcast %cst_30 : f32 to vector<8x64xf32>
    %71 = arith.maximumf %69, %70 : vector<8x64xf32>
    %c4 = arith.constant 4 : index
    %c0_31 = arith.constant 0 : index
    %72 = vector.load %arg10[%c4, %c0_31] : memref<18x64xf32, #tpu.memory_space<vmem>>, vector<1x64xf32>
    %c5 = arith.constant 5 : index
    %c0_32 = arith.constant 0 : index
    %73 = vector.load %arg10[%c5, %c0_32] : memref<18x64xf32, #tpu.memory_space<vmem>>, vector<1x64xf32>
    %cst_33 = arith.constant dense<0.000000e+00> : vector<8xf32>
    %74 = vector.multi_reduction <add>, %71, %cst_33 [1] : vector<8x64xf32> to vector<8xf32>
    %75 = vector.shape_cast %74 : vector<8xf32> to vector<8x1xf32>
    %cst_34 = arith.constant 6.400000e+01 : f32
    %76 = vector.broadcast %cst_34 : f32 to vector<8x1xf32>
    %77 = arith.divf %75, %76 : vector<8x1xf32>
    %78 = arith.mulf %71, %71 : vector<8x64xf32>
    %cst_35 = arith.constant dense<0.000000e+00> : vector<8xf32>
    %79 = vector.multi_reduction <add>, %78, %cst_35 [1] : vector<8x64xf32> to vector<8xf32>
    %80 = vector.shape_cast %79 : vector<8xf32> to vector<8x1xf32>
    %cst_36 = arith.constant 6.400000e+01 : f32
    %81 = vector.broadcast %cst_36 : f32 to vector<8x1xf32>
    %82 = arith.divf %80, %81 : vector<8x1xf32>
    %83 = arith.mulf %77, %77 : vector<8x1xf32>
    %84 = arith.subf %82, %83 : vector<8x1xf32>
    %cst_37 = arith.constant 0.000000e+00 : f32
    %85 = vector.broadcast %cst_37 : f32 to vector<8x1xf32>
    %86 = arith.maximumf %84, %85 : vector<8x1xf32>
    %87 = vector.broadcast %77 : vector<8x1xf32> to vector<8x64xf32>
    %88 = arith.subf %71, %87 : vector<8x64xf32>
    %cst_38 = arith.constant 9.99999974E-6 : f32
    %89 = vector.broadcast %cst_38 : f32 to vector<8x1xf32>
    %90 = arith.addf %86, %89 : vector<8x1xf32>
    %91 = math.rsqrt %90 : vector<8x1xf32>
    %92 = vector.broadcast %91 : vector<8x1xf32> to vector<8x64xf32>
    %93 = arith.mulf %88, %92 : vector<8x64xf32>
    %94 = vector.broadcast %72 : vector<1x64xf32> to vector<8x64xf32>
    %95 = arith.mulf %93, %94 : vector<8x64xf32>
    %96 = vector.broadcast %73 : vector<1x64xf32> to vector<8x64xf32>
    %97 = arith.addf %95, %96 : vector<8x64xf32>
    %c0_39 = arith.constant 0 : index
    %c0_40 = arith.constant 0 : index
    %98 = vector.load %arg2[%c0_39, %c0_40] : memref<8x64xf32, #tpu.memory_space<vmem>>, vector<8x64xf32>
    %c0_41 = arith.constant 0 : index
    %c0_42 = arith.constant 0 : index
    %99 = vector.load %arg3[%c0_41, %c0_42] : memref<8x1xf32, #tpu.memory_space<vmem>>, vector<8x1xf32>
    %100 = vector.broadcast %99 : vector<8x1xf32> to vector<8x64xf32>
    %101 = arith.mulf %98, %100 : vector<8x64xf32>
    %102 = tpu.concatenate %97, %101 in 1 : vector<8x64xf32>, vector<8x64xf32> -> vector<8x128xf32>
    %103 = arith.truncf %102 : vector<8x128xf32> to vector<8x128xbf16>
    %c0_43 = arith.constant 0 : index
    %c0_44 = arith.constant 0 : index
    %104 = vector.load %arg6[%c0_43, %c0_44] : memref<128x256xbf16, #tpu.memory_space<vmem>>, vector<128x256xbf16>
    %cst_45 = arith.constant dense<0.000000e+00> : vector<8x256xf32>
    %105 = tpu.matmul %103, %104, %cst_45 {dimension_numbers = #tpu.dot_dimension_numbers<[1], [0], [0], [1], [0, 0, 1, 1], [], []>} : vector<8x128xbf16>, vector<128x256xbf16>, vector<8x256xf32> -> vector<8x256xf32>
    %c0_46 = arith.constant 0 : index
    %c0_47 = arith.constant 0 : index
    %106 = vector.load %arg11[%c0_46, %c0_47] : memref<1x256xf32, #tpu.memory_space<vmem>>, vector<1x256xf32>
    %107 = vector.broadcast %106 : vector<1x256xf32> to vector<8x256xf32>
    %108 = arith.addf %105, %107 : vector<8x256xf32>
    %109 = vector.extract_strided_slice %108 {offsets = [0, 0], sizes = [8, 64], strides = [1, 1]} : vector<8x256xf32> to vector<8x64xf32>
    %cst_48 = arith.constant 5.000000e-01 : f32
    %110 = vector.broadcast %cst_48 : f32 to vector<8x64xf32>
    %111 = arith.mulf %110, %109 : vector<8x64xf32>
    %112 = math.tanh %111 : vector<8x64xf32>
    %cst_49 = arith.constant 5.000000e-01 : f32
    %113 = vector.broadcast %cst_49 : f32 to vector<8x64xf32>
    %114 = arith.mulf %113, %112 : vector<8x64xf32>
    %cst_50 = arith.constant 5.000000e-01 : f32
    %115 = vector.broadcast %cst_50 : f32 to vector<8x64xf32>
    %116 = arith.addf %114, %115 : vector<8x64xf32>
    %117 = vector.extract_strided_slice %108 {offsets = [0, 64], sizes = [8, 64], strides = [1, 1]} : vector<8x256xf32> to vector<8x64xf32>
    %cst_51 = arith.constant 5.000000e-01 : f32
    %118 = vector.broadcast %cst_51 : f32 to vector<8x64xf32>
    %119 = arith.mulf %118, %117 : vector<8x64xf32>
    %120 = math.tanh %119 : vector<8x64xf32>
    %cst_52 = arith.constant 5.000000e-01 : f32
    %121 = vector.broadcast %cst_52 : f32 to vector<8x64xf32>
    %122 = arith.mulf %121, %120 : vector<8x64xf32>
    %cst_53 = arith.constant 5.000000e-01 : f32
    %123 = vector.broadcast %cst_53 : f32 to vector<8x64xf32>
    %124 = arith.addf %122, %123 : vector<8x64xf32>
    %125 = vector.extract_strided_slice %108 {offsets = [0, 128], sizes = [8, 64], strides = [1, 1]} : vector<8x256xf32> to vector<8x64xf32>
    %126 = vector.extract_strided_slice %108 {offsets = [0, 192], sizes = [8, 64], strides = [1, 1]} : vector<8x256xf32> to vector<8x64xf32>
    %127 = arith.mulf %116, %126 : vector<8x64xf32>
    %128 = arith.addf %125, %127 : vector<8x64xf32>
    %129 = math.tanh %128 : vector<8x64xf32>
    %cst_54 = arith.constant 1.000000e+00 : f32
    %130 = vector.broadcast %cst_54 : f32 to vector<8x64xf32>
    %131 = arith.subf %130, %124 : vector<8x64xf32>
    %132 = arith.mulf %131, %129 : vector<8x64xf32>
    %133 = arith.mulf %124, %101 : vector<8x64xf32>
    %134 = arith.addf %132, %133 : vector<8x64xf32>
    %c6 = arith.constant 6 : index
    %c0_55 = arith.constant 0 : index
    %135 = vector.load %arg10[%c6, %c0_55] : memref<18x64xf32, #tpu.memory_space<vmem>>, vector<1x64xf32>
    %c7 = arith.constant 7 : index
    %c0_56 = arith.constant 0 : index
    %136 = vector.load %arg10[%c7, %c0_56] : memref<18x64xf32, #tpu.memory_space<vmem>>, vector<1x64xf32>
    %cst_57 = arith.constant dense<0.000000e+00> : vector<8xf32>
    %137 = vector.multi_reduction <add>, %134, %cst_57 [1] : vector<8x64xf32> to vector<8xf32>
    %138 = vector.shape_cast %137 : vector<8xf32> to vector<8x1xf32>
    %cst_58 = arith.constant 6.400000e+01 : f32
    %139 = vector.broadcast %cst_58 : f32 to vector<8x1xf32>
    %140 = arith.divf %138, %139 : vector<8x1xf32>
    %141 = arith.mulf %134, %134 : vector<8x64xf32>
    %cst_59 = arith.constant dense<0.000000e+00> : vector<8xf32>
    %142 = vector.multi_reduction <add>, %141, %cst_59 [1] : vector<8x64xf32> to vector<8xf32>
    %143 = vector.shape_cast %142 : vector<8xf32> to vector<8x1xf32>
    %cst_60 = arith.constant 6.400000e+01 : f32
    %144 = vector.broadcast %cst_60 : f32 to vector<8x1xf32>
    %145 = arith.divf %143, %144 : vector<8x1xf32>
    %146 = arith.mulf %140, %140 : vector<8x1xf32>
    %147 = arith.subf %145, %146 : vector<8x1xf32>
    %cst_61 = arith.constant 0.000000e+00 : f32
    %148 = vector.broadcast %cst_61 : f32 to vector<8x1xf32>
    %149 = arith.maximumf %147, %148 : vector<8x1xf32>
    %150 = vector.broadcast %140 : vector<8x1xf32> to vector<8x64xf32>
    %151 = arith.subf %134, %150 : vector<8x64xf32>
    %cst_62 = arith.constant 9.99999974E-6 : f32
    %152 = vector.broadcast %cst_62 : f32 to vector<8x1xf32>
    %153 = arith.addf %149, %152 : vector<8x1xf32>
    %154 = math.rsqrt %153 : vector<8x1xf32>
    %155 = vector.broadcast %154 : vector<8x1xf32> to vector<8x64xf32>
    %156 = arith.mulf %151, %155 : vector<8x64xf32>
    %157 = vector.broadcast %135 : vector<1x64xf32> to vector<8x64xf32>
    %158 = arith.mulf %156, %157 : vector<8x64xf32>
    %159 = vector.broadcast %136 : vector<1x64xf32> to vector<8x64xf32>
    %160 = arith.addf %158, %159 : vector<8x64xf32>
    %c8 = arith.constant 8 : index
    %c0_63 = arith.constant 0 : index
    %161 = vector.load %arg10[%c8, %c0_63] : memref<18x64xf32, #tpu.memory_space<vmem>>, vector<1x64xf32>
    %c9 = arith.constant 9 : index
    %c0_64 = arith.constant 0 : index
    %162 = vector.load %arg10[%c9, %c0_64] : memref<18x64xf32, #tpu.memory_space<vmem>>, vector<1x64xf32>
    %cst_65 = arith.constant dense<0.000000e+00> : vector<8xf32>
    %163 = vector.multi_reduction <add>, %160, %cst_65 [1] : vector<8x64xf32> to vector<8xf32>
    %164 = vector.shape_cast %163 : vector<8xf32> to vector<8x1xf32>
    %cst_66 = arith.constant 6.400000e+01 : f32
    %165 = vector.broadcast %cst_66 : f32 to vector<8x1xf32>
    %166 = arith.divf %164, %165 : vector<8x1xf32>
    %167 = arith.mulf %160, %160 : vector<8x64xf32>
    %cst_67 = arith.constant dense<0.000000e+00> : vector<8xf32>
    %168 = vector.multi_reduction <add>, %167, %cst_67 [1] : vector<8x64xf32> to vector<8xf32>
    %169 = vector.shape_cast %168 : vector<8xf32> to vector<8x1xf32>
    %cst_68 = arith.constant 6.400000e+01 : f32
    %170 = vector.broadcast %cst_68 : f32 to vector<8x1xf32>
    %171 = arith.divf %169, %170 : vector<8x1xf32>
    %172 = arith.mulf %166, %166 : vector<8x1xf32>
    %173 = arith.subf %171, %172 : vector<8x1xf32>
    %cst_69 = arith.constant 0.000000e+00 : f32
    %174 = vector.broadcast %cst_69 : f32 to vector<8x1xf32>
    %175 = arith.maximumf %173, %174 : vector<8x1xf32>
    %176 = vector.broadcast %166 : vector<8x1xf32> to vector<8x64xf32>
    %177 = arith.subf %160, %176 : vector<8x64xf32>
    %cst_70 = arith.constant 9.99999974E-6 : f32
    %178 = vector.broadcast %cst_70 : f32 to vector<8x1xf32>
    %179 = arith.addf %175, %178 : vector<8x1xf32>
    %180 = math.rsqrt %179 : vector<8x1xf32>
    %181 = vector.broadcast %180 : vector<8x1xf32> to vector<8x64xf32>
    %182 = arith.mulf %177, %181 : vector<8x64xf32>
    %183 = vector.broadcast %161 : vector<1x64xf32> to vector<8x64xf32>
    %184 = arith.mulf %182, %183 : vector<8x64xf32>
    %185 = vector.broadcast %162 : vector<1x64xf32> to vector<8x64xf32>
    %186 = arith.addf %184, %185 : vector<8x64xf32>
    %187 = arith.truncf %186 : vector<8x64xf32> to vector<8x64xbf16>
    %c0_71 = arith.constant 0 : index
    %c0_72 = arith.constant 0 : index
    %188 = vector.load %arg7[%c0_71, %c0_72] : memref<64x64xbf16, #tpu.memory_space<vmem>>, vector<64x64xbf16>
    %cst_73 = arith.constant dense<0.000000e+00> : vector<8x64xf32>
    %189 = tpu.matmul %187, %188, %cst_73 {dimension_numbers = #tpu.dot_dimension_numbers<[1], [0], [0], [1], [0, 0, 1, 1], [], []>} : vector<8x64xbf16>, vector<64x64xbf16>, vector<8x64xf32> -> vector<8x64xf32>
    %c10 = arith.constant 10 : index
    %c0_74 = arith.constant 0 : index
    %190 = vector.load %arg10[%c10, %c0_74] : memref<18x64xf32, #tpu.memory_space<vmem>>, vector<1x64xf32>
    %191 = vector.broadcast %190 : vector<1x64xf32> to vector<8x64xf32>
    %192 = arith.addf %189, %191 : vector<8x64xf32>
    %cst_75 = arith.constant 0.000000e+00 : f32
    %193 = vector.broadcast %cst_75 : f32 to vector<8x64xf32>
    %194 = arith.maximumf %192, %193 : vector<8x64xf32>
    %c11 = arith.constant 11 : index
    %c0_76 = arith.constant 0 : index
    %195 = vector.load %arg10[%c11, %c0_76] : memref<18x64xf32, #tpu.memory_space<vmem>>, vector<1x64xf32>
    %c12 = arith.constant 12 : index
    %c0_77 = arith.constant 0 : index
    %196 = vector.load %arg10[%c12, %c0_77] : memref<18x64xf32, #tpu.memory_space<vmem>>, vector<1x64xf32>
    %cst_78 = arith.constant dense<0.000000e+00> : vector<8xf32>
    %197 = vector.multi_reduction <add>, %194, %cst_78 [1] : vector<8x64xf32> to vector<8xf32>
    %198 = vector.shape_cast %197 : vector<8xf32> to vector<8x1xf32>
    %cst_79 = arith.constant 6.400000e+01 : f32
    %199 = vector.broadcast %cst_79 : f32 to vector<8x1xf32>
    %200 = arith.divf %198, %199 : vector<8x1xf32>
    %201 = arith.mulf %194, %194 : vector<8x64xf32>
    %cst_80 = arith.constant dense<0.000000e+00> : vector<8xf32>
    %202 = vector.multi_reduction <add>, %201, %cst_80 [1] : vector<8x64xf32> to vector<8xf32>
    %203 = vector.shape_cast %202 : vector<8xf32> to vector<8x1xf32>
    %cst_81 = arith.constant 6.400000e+01 : f32
    %204 = vector.broadcast %cst_81 : f32 to vector<8x1xf32>
    %205 = arith.divf %203, %204 : vector<8x1xf32>
    %206 = arith.mulf %200, %200 : vector<8x1xf32>
    %207 = arith.subf %205, %206 : vector<8x1xf32>
    %cst_82 = arith.constant 0.000000e+00 : f32
    %208 = vector.broadcast %cst_82 : f32 to vector<8x1xf32>
    %209 = arith.maximumf %207, %208 : vector<8x1xf32>
    %210 = vector.broadcast %200 : vector<8x1xf32> to vector<8x64xf32>
    %211 = arith.subf %194, %210 : vector<8x64xf32>
    %cst_83 = arith.constant 9.99999974E-6 : f32
    %212 = vector.broadcast %cst_83 : f32 to vector<8x1xf32>
    %213 = arith.addf %209, %212 : vector<8x1xf32>
    %214 = math.rsqrt %213 : vector<8x1xf32>
    %215 = vector.broadcast %214 : vector<8x1xf32> to vector<8x64xf32>
    %216 = arith.mulf %211, %215 : vector<8x64xf32>
    %217 = vector.broadcast %195 : vector<1x64xf32> to vector<8x64xf32>
    %218 = arith.mulf %216, %217 : vector<8x64xf32>
    %219 = vector.broadcast %196 : vector<1x64xf32> to vector<8x64xf32>
    %220 = arith.addf %218, %219 : vector<8x64xf32>
    %221 = arith.truncf %220 : vector<8x64xf32> to vector<8x64xbf16>
    %c0_84 = arith.constant 0 : index
    %c0_85 = arith.constant 0 : index
    %222 = vector.load %arg8[%c0_84, %c0_85] : memref<64x64xbf16, #tpu.memory_space<vmem>>, vector<64x64xbf16>
    %cst_86 = arith.constant dense<0.000000e+00> : vector<8x64xf32>
    %223 = tpu.matmul %221, %222, %cst_86 {dimension_numbers = #tpu.dot_dimension_numbers<[1], [0], [0], [1], [0, 0, 1, 1], [], []>} : vector<8x64xbf16>, vector<64x64xbf16>, vector<8x64xf32> -> vector<8x64xf32>
    %c13 = arith.constant 13 : index
    %c0_87 = arith.constant 0 : index
    %224 = vector.load %arg10[%c13, %c0_87] : memref<18x64xf32, #tpu.memory_space<vmem>>, vector<1x64xf32>
    %225 = vector.broadcast %224 : vector<1x64xf32> to vector<8x64xf32>
    %226 = arith.addf %223, %225 : vector<8x64xf32>
    %cst_88 = arith.constant 0.000000e+00 : f32
    %227 = vector.broadcast %cst_88 : f32 to vector<8x64xf32>
    %228 = arith.maximumf %226, %227 : vector<8x64xf32>
    %c14 = arith.constant 14 : index
    %c0_89 = arith.constant 0 : index
    %229 = vector.load %arg10[%c14, %c0_89] : memref<18x64xf32, #tpu.memory_space<vmem>>, vector<1x64xf32>
    %c15 = arith.constant 15 : index
    %c0_90 = arith.constant 0 : index
    %230 = vector.load %arg10[%c15, %c0_90] : memref<18x64xf32, #tpu.memory_space<vmem>>, vector<1x64xf32>
    %cst_91 = arith.constant dense<0.000000e+00> : vector<8xf32>
    %231 = vector.multi_reduction <add>, %228, %cst_91 [1] : vector<8x64xf32> to vector<8xf32>
    %232 = vector.shape_cast %231 : vector<8xf32> to vector<8x1xf32>
    %cst_92 = arith.constant 6.400000e+01 : f32
    %233 = vector.broadcast %cst_92 : f32 to vector<8x1xf32>
    %234 = arith.divf %232, %233 : vector<8x1xf32>
    %235 = arith.mulf %228, %228 : vector<8x64xf32>
    %cst_93 = arith.constant dense<0.000000e+00> : vector<8xf32>
    %236 = vector.multi_reduction <add>, %235, %cst_93 [1] : vector<8x64xf32> to vector<8xf32>
    %237 = vector.shape_cast %236 : vector<8xf32> to vector<8x1xf32>
    %cst_94 = arith.constant 6.400000e+01 : f32
    %238 = vector.broadcast %cst_94 : f32 to vector<8x1xf32>
    %239 = arith.divf %237, %238 : vector<8x1xf32>
    %240 = arith.mulf %234, %234 : vector<8x1xf32>
    %241 = arith.subf %239, %240 : vector<8x1xf32>
    %cst_95 = arith.constant 0.000000e+00 : f32
    %242 = vector.broadcast %cst_95 : f32 to vector<8x1xf32>
    %243 = arith.maximumf %241, %242 : vector<8x1xf32>
    %244 = vector.broadcast %234 : vector<8x1xf32> to vector<8x64xf32>
    %245 = arith.subf %228, %244 : vector<8x64xf32>
    %cst_96 = arith.constant 9.99999974E-6 : f32
    %246 = vector.broadcast %cst_96 : f32 to vector<8x1xf32>
    %247 = arith.addf %243, %246 : vector<8x1xf32>
    %248 = math.rsqrt %247 : vector<8x1xf32>
    %249 = vector.broadcast %248 : vector<8x1xf32> to vector<8x64xf32>
    %250 = arith.mulf %245, %249 : vector<8x64xf32>
    %251 = vector.broadcast %229 : vector<1x64xf32> to vector<8x64xf32>
    %252 = arith.mulf %250, %251 : vector<8x64xf32>
    %253 = vector.broadcast %230 : vector<1x64xf32> to vector<8x64xf32>
    %254 = arith.addf %252, %253 : vector<8x64xf32>
    %c16 = arith.constant 16 : index
    %c0_97 = arith.constant 0 : index
    %255 = vector.load %arg10[%c16, %c0_97] : memref<18x64xf32, #tpu.memory_space<vmem>>, vector<1x64xf32>
    %256 = vector.broadcast %255 : vector<1x64xf32> to vector<8x64xf32>
    %257 = arith.mulf %254, %256 : vector<8x64xf32>
    %cst_98 = arith.constant dense<0.000000e+00> : vector<8xf32>
    %258 = vector.multi_reduction <add>, %257, %cst_98 [1] : vector<8x64xf32> to vector<8xf32>
    %259 = vector.shape_cast %258 : vector<8xf32> to vector<8x1xf32>
    %c17 = arith.constant 17 : index
    %c0_99 = arith.constant 0 : index
    %260 = vector.load %arg10[%c17, %c0_99] : memref<18x64xf32, #tpu.memory_space<vmem>>, vector<1x1xf32>
    %261 = vector.broadcast %260 : vector<1x1xf32> to vector<8x1xf32>
    %262 = arith.addf %259, %261 : vector<8x1xf32>
    %263 = vector.shape_cast %262 : vector<8x1xf32> to vector<8x1xf32>
    %264 = vector.broadcast %263 : vector<8x1xf32> to vector<8x64xf32>
    %265 = tpu.concatenate %134, %264 in 1 : vector<8x64xf32>, vector<8x64xf32> -> vector<8x128xf32>
    %c0_100 = arith.constant 0 : index
    %c0_101 = arith.constant 0 : index
    %266 = vector.load %arg12[%c0_100, %c0_101] : memref<8x128xf32, #tpu.memory_space<vmem>>, vector<8x128xf32>
    tpu.vector_store %arg12[%c0_100, %c0_101], %265 {strides = array<i32>} : memref<8x128xf32, #tpu.memory_space<vmem>>, vector<8x128xf32>,
    return
  }
  func.func @transform_0(%arg0: i32) -> (i32, i32) {
    %c0_i32 = arith.constant 0 : i32
    %c0_i32_0 = arith.constant 0 : i32
    return %arg0, %c0_i32 : i32, i32
  }
  func.func @transform_1(%arg0: i32) -> (i32, i32) {
    %c0_i32 = arith.constant 0 : i32
    %c0_i32_0 = arith.constant 0 : i32
    return %arg0, %c0_i32 : i32, i32
  }
  func.func @transform_2(%arg0: i32) -> (i32, i32) {
    %c0_i32 = arith.constant 0 : i32
    %c0_i32_0 = arith.constant 0 : i32
    return %arg0, %c0_i32 : i32, i32
  }
  func.func @transform_3(%arg0: i32) -> (i32, i32) {
    %c0_i32 = arith.constant 0 : i32
    %c0_i32_0 = arith.constant 0 : i32
    %c0_i32_1 = arith.constant 0 : i32
    return %c0_i32, %c0_i32_0 : i32, i32
  }
  func.func @transform_4(%arg0: i32) -> (i32, i32) {
    %c0_i32 = arith.constant 0 : i32
    %c0_i32_0 = arith.constant 0 : i32
    %c0_i32_1 = arith.constant 0 : i32
    return %c0_i32, %c0_i32_0 : i32, i32
  }
  func.func @transform_5(%arg0: i32) -> (i32, i32) {
    %c0_i32 = arith.constant 0 : i32
    %c0_i32_0 = arith.constant 0 : i32
    %c0_i32_1 = arith.constant 0 : i32
    return %c0_i32, %c0_i32_0 : i32, i32
  }
  func.func @transform_6(%arg0: i32) -> (i32, i32) {
    %c0_i32 = arith.constant 0 : i32
    %c0_i32_0 = arith.constant 0 : i32
    %c0_i32_1 = arith.constant 0 : i32
    return %c0_i32, %c0_i32_0 : i32, i32
  }
  func.func @transform_7(%arg0: i32) -> (i32, i32) {
    %c0_i32 = arith.constant 0 : i32
    %c0_i32_0 = arith.constant 0 : i32
    %c0_i32_1 = arith.constant 0 : i32
    return %c0_i32, %c0_i32_0 : i32, i32
  }
  func.func @transform_8(%arg0: i32) -> (i32, i32) {
    %c0_i32 = arith.constant 0 : i32
    %c0_i32_0 = arith.constant 0 : i32
    %c0_i32_1 = arith.constant 0 : i32
    return %c0_i32, %c0_i32_0 : i32, i32
  }
  func.func @transform_9(%arg0: i32) -> (i32, i32) {
    %c0_i32 = arith.constant 0 : i32
    %c0_i32_0 = arith.constant 0 : i32
    %c0_i32_1 = arith.constant 0 : i32
    return %c0_i32, %c0_i32_0 : i32, i32
  }
  func.func @transform_10(%arg0: i32) -> (i32, i32) {
    %c0_i32 = arith.constant 0 : i32
    %c0_i32_0 = arith.constant 0 : i32
    %c0_i32_1 = arith.constant 0 : i32
    return %c0_i32, %c0_i32_0 : i32, i32
  }
  func.func @transform_11(%arg0: i32) -> (i32, i32) {
    %c0_i32 = arith.constant 0 : i32
    %c0_i32_0 = arith.constant 0 : i32
    return %arg0, %c0_i32 : i32, i32
  }
}

</mosaic_0001>

<bundles_post_ra>
// kernel: tpu_custom_call.1
= control target key start
LH: loop header
LB: loop body
LE: loop exit
PB: predicated region body
PF: predicated region fallthrough
CT: control target
= control target key end

     0   :  { %16 = vsyncpa [#allocation3], 0  ;;  %s1413_s0 = inlined_call_operand.vmem [shape: f32[8,36], index: 0, kind: input, shape index: {}]   ;;  %s1414_s1 = inlined_call_operand.hbm [shape: f32[8,64], index: 1, kind: input, shape index: {}]   ;;  %s1415_s2 = inlined_call_operand.vmem [shape: f32[8,1], index: 2, kind: input, shape index: {}]   ;;  %s1416_s3 = inlined_call_operand.hbm [shape: bf16[36,64], index: 3, kind: input, shape index: {}]   ;;  %s1417_s4 = inlined_call_operand.hbm [shape: bf16[64,64], index: 4, kind: input, shape index: {}]   ;;  %s1418_s5 = inlined_call_operand.hbm [shape: bf16[128,256], index: 5, kind: input, shape index: {}]   ;;  %s1419_s6 = inlined_call_operand.hbm [shape: bf16[64,64], index: 6, kind: input, shape index: {}]   ;;  %s1420_s7 = inlined_call_operand.hbm [shape: bf16[64,64], index: 7, kind: input, shape index: {}]   ;;  %s1421_s8 = inlined_call_operand.vmem [shape: f32[3,36], index: 8, kind: input, shape index: {}]   ;;  %s1422_s9 = inlined_call_operand.hbm [shape: f32[18,64], index: 9, kind: input, shape index: {}]   ;;  %s1423_s10 = inlined_call_operand.vmem [shape: f32[1,256], index: 10, kind: input, shape index: {}]   ;;  %s1424_s11 = inlined_call_operand.hbm [shape: f32[8,128], index: 11, kind: output, shape index: {}]  }
   0x1   :  { %17 = vsyncpa [#allocation6], 0 }
   0x2   :  { %18 = vsyncpa [#allocation9], 0 }
   0x3   :  { %19 = vsyncpa [#allocation12], 0  ;;  %s40_s19 = sshll.u32 %s1416_s3, 4  ;;  %s41_s19 = int_to_ptr.hbm [resolvable:$true] %s40_s19 }
   0x4   :  { %20 = vsyncpa [#allocation4], 0  ;;  %s1222_s20 = smov [#allocation5]   ;;  %s66_s24 = sshll.u32 %s1418_s5, 4  ;;  %s67_s24 = int_to_ptr.hbm [resolvable:$true] %s66_s24 }
   0x5   :  { %s42_s21 = sshll.u32 %s1222_s20, 4  ;;  %s1223_s25 = smov 64   ;;  %s43_s21 = int_to_ptr.vmem [resolvable:$true] %s42_s21 }
   0x6   :  { %s1224_s26 = smov 4   ;;  %s1225_s27 = smov [#allocation8]  }
   0x7   :  { %48 = dma.hbm_to_vmem [thread:$0]  %s41_s19, 320, %s43_s21, [#allocation6], %s1223_s25, %s1223_s25, %s1224_s26  }
   0x8   :  { %s68_s28 = sshll.u32 %s1225_s27, 4  ;;  %s1226_s3 = smov 128   ;;  %s69_s28 = int_to_ptr.vmem [resolvable:$true] %s68_s28 }
   0x9   :  { %s1227_s29 = smov 8   ;;  %s92_s5 = sshll.u32 %s1420_s7, 4  ;;  %s93_s5 = int_to_ptr.hbm [resolvable:$true] %s92_s5 }
   0xa   :  { %74 = dma.hbm_to_vmem [thread:$0]  %s67_s24, 2048, %s69_s28, [#allocation9], %s1226_s3, %s1226_s3, %s1227_s29  }
   0xb   :  { %s1228_s13 = smov [#allocation11]   ;;  %s28_s17 = sshll.u32 %s1414_s1, 4  ;;  %s29_s17 = int_to_ptr.hbm [resolvable:$true] %s28_s17 }
   0xc   :  { %s94_s14 = sshll.u32 %s1228_s13, 4  ;;  %s1229_s18 = smov [#allocation2]   ;;  %s95_s14 = int_to_ptr.vmem [resolvable:$true] %s94_s14 }
   0xd   :  { %100 = dma.hbm_to_vmem [thread:$0]  %s93_s5, 512, %s95_s14, [#allocation12], %s1223_s25, %s1223_s25, %s1224_s26  }
   0xe   :  { %s30_s19 = sshll.u32 %s1229_s18, 4  ;;  %s53_s22 = sshll.u32 %s1417_s4, 4  ;;  %s31_s19 = int_to_ptr.vmem [resolvable:$true] %s30_s19  ;;  %s54_s22 = int_to_ptr.hbm [resolvable:$true] %s53_s22 }
   0xf   :  { %33 = dma.hbm_to_vmem [thread:$0]  %s29_s17, 128, %s31_s19, [#allocation3]  }
  0x10   :  { %s79_s24 = sshll.u32 %s1419_s6, 4  ;;  %s1230_s27 = smov [#allocation7]   ;;  %s80_s24 = int_to_ptr.hbm [resolvable:$true] %s79_s24 }
  0x11   :  { %s55_s1 = sshll.u32 %s1230_s27, 4  ;;  %s1231_s28 = smov [#allocation10]   ;;  %s56_s1 = int_to_ptr.vmem [resolvable:$true] %s55_s1 }
  0x12   :  { %61 = dma.hbm_to_vmem [thread:$0]  %s54_s22, 512, %s56_s1, [#allocation6], %s1223_s25, %s1223_s25, %s1224_s26  }
  0x13   :  { %s81_s30 = sshll.u32 %s1231_s28, 4  ;;  %s107_s4 = sshll.u32 %s1422_s9, 4  ;;  %s82_s30 = int_to_ptr.vmem [resolvable:$true] %s81_s30  ;;  %s108_s4 = int_to_ptr.hbm [resolvable:$true] %s107_s4 }
  0x14   :  { %87 = dma.hbm_to_vmem [thread:$0]  %s80_s24, 512, %s82_s30, [#allocation9], %s1223_s25, %s1223_s25, %s1224_s26  }
  0x15   :  { %s1232_s6 = smov [#allocation13]  }
  0x16   :  { %s109_s13 = sshll.u32 %s1232_s6, 4  ;;  %s110_s13 = int_to_ptr.vmem [resolvable:$true] %s109_s13 }
  0x17   :  { %115 = dma.hbm_to_vmem [thread:$0]  %s108_s4, 384, %s110_s13, [#allocation12], %s1226_s3, %s1226_s3, %s1227_s29  }
  0x18   :  { %1212 = dma.done.wait [#allocation3], 128  }
  0x19   :  { %1213 = vsyncadd [#allocation3], 4294967168 }
  0x1a   :  { %1214 = dma.done.wait [#allocation6], 832  }
  0x1b   :  { %1215 = vsyncadd [#allocation6], 4294966464 }
  0x1c   :  { %1216 = dma.done.wait [#allocation9], 2560  }
  0x1d   :  { %1217 = vsyncadd [#allocation9], 4294964736 }
  0x1e   :  { %1218 = dma.done.wait [#allocation12], 896  }
  0x1f   :  { %1219 = vsyncadd [#allocation12], 4294966400  ;;  %v147_v0 = vld [vmem:[%s1413_s0] sm:$0xff]  ;;  %vm151_vm0 = vcmask 293888   ;;  %v188_v6 = vld [vmem:[#allocation5 + $0x10] sm:$0x3] }
  0x20   :  { %v979_v1 = vld [vmem:[%s1421_s8] ss:$0 sm:$0xff]  ;;  %v200_v7 = vunpack.c.l.b16 %v188_v6  ;;  %vm209_vm1 = vcmask 1041408   ;;  %v934_v11 = vld [vmem:[#allocation5 + $0x8] sm:$0xff]  ;;  %v933_v12 = vld [vmem:[#allocation5] sm:$0xff]  ;;  %vm229_vm5 = vcmask 523264  }
  0x21   :  { %v150_v2 = vmul.f32 %v979_v1, %v147_v0  ;;  %v980_v27 = vld [vmem:[%s1421_s8 + $0x1] ss:$0 sm:$0xff]  ;;  %v981_v30 = vld [vmem:[%s1421_s8 + $0x2] ss:$0 sm:$0xff]  ;;  %v982_v34 = vld [vmem:[#allocation13] ss:$0 sm:$0xff] }
  0x22   :  { %v203_v8 = vpack.c.b16 %v200_v7, %v200_v7  ;;  %v1233_v42 = vmov 64.0   ;;  %v938_v47 = vld [vmem:[#allocation7 + $0x18] sm:$0xff]  ;;  %v937_v49 = vld [vmem:[#allocation7 + $0x10] sm:$0xff]  ;;  %v936_v51 = vld [vmem:[#allocation7 + $0x8] sm:$0xff]  ;;  %v1234_v60 = vmov 0   ;;  %s796_s21 = sshll.u32 %s1424_s11, 4  ;;  %s797_s21 = int_to_ptr.hbm [resolvable:$true] %s796_s21 }
  0x23   :  { %v152_v3 = vsel %vm151_vm0, %v150_v2, 0.0  ;;  %v156_v4 = vmul.f32 %v150_v2, %v150_v2  ;;  %308 = vmatpush.bf16.msra.mxu1 %v938_v47  ;;  %v935_v53 = vld [vmem:[#allocation7] sm:$0xff]  ;;  %977 = vset.pattern.permute.xlu2 %v1234_v60 }
  0x24   :  { %153 = vadd.xlane.f32.xlu0 %v152_v3  ;;  %v211_v9 = vsel %vm209_vm1, %v203_v8, 0  ;;  %v350_v59 = vld [vmem:[%s1415_s2] sm:$0xff]  ;;  %v983_v6 = vld [vmem:[#allocation13 + $0x1] ss:$0 sm:$0xff] }
  0x25   :  { %v157_v5 = vsel %vm151_vm0, %v156_v4, 0.0  ;;  %218 = vmatpush.bf16.msra.mxu0 %v211_v9  ;;  %978 = vset.pattern.permute.xlu0 %v1234_v60  ;;  %v984_v9 = vld [vmem:[#allocation13 + $0x2] ss:$0 sm:$0xff] }
  0x26   :  { %353 = vperm.xlu2 %977, %v350_v59   ;;  %v855_v59 = vld [vmem:[#allocation8 + $0x28] sm:$0xf0] }
  0x27   :  { %309 = vmatpush.bf16.msra.mxu1 %v937_v49  ;;  %v946_v49 = vld [vmem:[#allocation8 + $0x34] sm:$0xf0] }
  0x29   :  { %219 = vmatpush.bf16.msra.mxu0 %v934_v11 }
  0x2b   :  { %310 = vmatpush.bf16.msra.mxu1 %v936_v51 }
  0x2c   :  { %158 = vadd.xlane.f32.xlu0 %v157_v5 }
  0x2d   :  { %220 = vmatpush.bf16.msra.mxu0 %v933_v12 }
  0x2f   :  { %311 = vmatpush.bf16.msra.mxu1 %v935_v53  ;;  %v863_v53 = vld [vmem:[#allocation8 + $0x38] sm:$0xf0] }
  0x97   :  { %v154_v10 = vpop.xlane.xlu0 %153 }
  0x98   :  { %v155_v13 = vmul.f32 0.03125, %v154_v10 }
  0x9a   :  { %v161_v15 = vmul.f32 %v155_v13, %v155_v13  ;;  %v164_v26 = vsub.f32 %v147_v0, %v155_v13  ;;  %v354_v13 = vpop.permute.xlu2 %353 }
  0x9f   :  { %v159_v14 = vpop.xlane.xlu0 %158 }
  0xa0   :  { %v160_v16 = vmul.f32 0.03125, %v159_v14  ;;  %v349_v14 = vld [vmem:[#allocation2] sm:$0xff] }
  0xa2   :  { %v162_v17 = vsub.f32 %v160_v16, %v161_v15  ;;  %v356_v15 = vmul.f32 %v354_v13, %v349_v14  ;;  %v985_v16 = vld [vmem:[#allocation13 + $0x3] ss:$0 sm:$0xff] }
  0xa4   :  { %v163_v18 = vmax.f32 %v162_v17, 0.0 }
  0xa6   :  { %v165_v19 = vadd.f32 1e-05, %v163_v18 }
  0xa8   :  { %1000 = vrsqrt.f32 %v165_v19  ;;  %vm172_vm3 = vweird.f32 %v165_v19 }
  0xa9   :  { %1002 = vrcp.f32 %v1233_v42  ;;  %v869_v42 = vld [vmem:[#allocation8 + $0x40] sm:$0xf] }
  0xae   :  { %v1001_v20 = vpop.eup %1000 }
  0xaf   :  { %v167_v21 = vmul.f32 %v1001_v20, %v165_v19  ;;  %vm173_vm2 = vweird.f32 %v1001_v20  ;;  %v1003_v43 = vpop.eup %1002 }
  0xb0   :  { %vm174_vm4 = vmor %vm172_vm3, %vm173_vm2  ;;  %v234_v44 = vmul.f32 64.0, %v1003_v43  ;;  %vm238_vm6 = vweird.f32 %v1003_v43 }
  0xb1   :  { %v168_v22 = vmul.f32 %v1001_v20, %v167_v21 }
  0xb2   :  { %v235_v45 = vsub.f32 1.0, %v234_v44  ;;  %v947_v44 = vld [vmem:[#allocation8 + $0x44] sm:$0xf] }
  0xb3   :  { %v169_v23 = vmul.f32 0.5, %v168_v22 }
  0xb4   :  { %v236_v46 = vmul.f32 %v1003_v43, %v235_v45 }
  0xb5   :  { %v170_v24 = vsub.f32 1.5, %v169_v23 }
  0xb6   :  { %v237_v48 = vadd.f32 %v1003_v43, %v236_v46  ;;  %v871_v46 = vld [vmem:[#allocation8 + $0x48] sm:$0xf0] }
  0xb7   :  { %v171_v25 = vmul.f32 %v1001_v20, %v170_v24  ;;  %v893_v24 = vld [vmem:[#allocation8 + $0x70] sm:$0xf]  ;;  %v874_v47 = vor.u32 %v947_v44, %v871_v46 }
  0xb8   :  { %v1352_v52 = vsel %vm238_vm6, %v1003_v43, %v237_v48  ;;  %v948_v43 = vld [vmem:[#allocation8 + $0x44] sm:$0xf0]  ;;  %v861_v48 = vld [vmem:[#allocation8 + $0x30] sm:$0xf] }
  0xb9   :  { %v175_v28 = vsel %vm174_vm4, %v1001_v20, %v171_v25  ;;  %v954_v25 = vld [vmem:[#allocation8 + $0x74] sm:$0xf0]  ;;  %v870_v45 = vor.u32 %v948_v43, %v869_v42  ;;  %v862_v51 = vor.u32 %v946_v49, %v861_v48 }
  0xba   :  { %v176_v29 = vmul.f32 %v175_v28, %v164_v26  ;;  %v953_v26 = vld [vmem:[#allocation8 + $0x74] sm:$0xf]  ;;  %v895_v28 = vld [vmem:[#allocation8 + $0x78] sm:$0xf0] }
  0xbc   :  { %v179_v31 = vmul.f32 %v980_v27, %v176_v29  ;;  %v894_v27 = vor.u32 %v954_v25, %v893_v24  ;;  %v898_v29 = vor.u32 %v953_v26, %v895_v28  ;;  %v986_v25 = vld [vmem:[#allocation13 + $0x4] ss:$0 sm:$0xff]  ;;  %v987_v28 = vld [vmem:[#allocation13 + $0x5] ss:$0 sm:$0xff] }
  0xbe   :  { %v182_v32 = vadd.f32 %v981_v30, %v179_v31  ;;  %465 = vmatpush.bf16.msra.mxu2 %v894_v27  ;;  %478 = vmatpush.bf16.msra.mxu3 %v898_v29  ;;  %v885_v30 = vld [vmem:[#allocation8 + $0x60] sm:$0xf]  ;;  %v952_v31 = vld [vmem:[#allocation8 + $0x64] sm:$0xf0] }
  0xc0   :  { %v183_v33 = vpack.c.bf16 %v182_v32, %v182_v32  ;;  %v951_v32 = vld [vmem:[#allocation8 + $0x64] sm:$0xf] }
  0xc2   :  { %817 = vmatmul.msk.bf16.vlgmr.msra.gmra.mxu0 %vm151_vm0, %v183_v33  ;;  %v886_v33 = vor.u32 %v952_v31, %v885_v30 }
  0xc4   :  { %466 = vmatpush.bf16.msra.mxu2 %v886_v33 }
 0x13f   :  { %v222_v35 = vpop.f32.mrf.mxu0 }
 0x140   :  { %v223_v36 = vadd.f32 %v982_v34, %v222_v35  ;;  %v887_v34 = vld [vmem:[#allocation8 + $0x68] sm:$0xf0] }
 0x141   :  { %v890_v35 = vor.u32 %v951_v32, %v887_v34  ;;  %v379_v34 = vld [vmem:[%s1423_s10] sm:$0x3]  ;;  %s1235_s10 = smov [#allocation14]  }
 0x142   :  { %v226_v37 = vmax.f32 %v223_v36, 0.0  ;;  %v877_v36 = vld [vmem:[#allocation8 + $0x50] sm:$0xf] }
 0x143   :  { %479 = vmatpush.bf16.msra.mxu3 %v890_v35  ;;  %v382_v35 = vperm.slane %v379_v34, 1 }
 0x144   :  { %v230_v38 = vsel %vm229_vm5, %v226_v37, 0.0  ;;  %v241_v40 = vmul.f32 %v226_v37, %v226_v37 }
 0x145   :  { %231 = vadd.xlane.f32.xlu1 %v230_v38  ;;  %v949_v38 = vld [vmem:[#allocation8 + $0x54] sm:$0xf] }
 0x146   :  { %v242_v41 = vsel %vm229_vm5, %v241_v40, 0.0  ;;  %v879_v40 = vld [vmem:[#allocation8 + $0x58] sm:$0xf0] }
 0x147   :  { %v224_v39 = vpop.f32.mrf.mxu0 }
 0x14d   :  { %243 = vadd.xlane.f32.xlu1 %v242_v41  ;;  %v882_v41 = vor.u32 %v949_v38, %v879_v40  ;;  %v381_v40 = vperm.slane %v379_v34, 0  ;;  %v958_v34 = vld [vmem:[#allocation10 + $0x18] sm:$0xff] }
 0x14e   :  { %649 = vmatpush.bf16.msrb.mxu0 %v958_v34 }
 0x14f   :  { %480 = vmatpush.bf16.msra.mxu3 %v882_v41 }
 0x153   :  { %481 = vmatpush.bf16.msra.mxu3 %v874_v47 }
 0x166   :  { %358 = vrot.lane.b32.xlu1 %v356_v15, %s1223_s25 }
 0x1b8   :  { %v232_v50 = vpop.xlane.xlu1 %231 }
 0x1b9   :  { %v240_v54 = vmul.f32 %v1352_v52, %v232_v50  ;;  %v945_v50 = vld [vmem:[#allocation8 + $0x34] sm:$0xf] }
 0x1bb   :  { %v246_v56 = vmul.f32 %v240_v54, %v240_v54  ;;  %v249_v5 = vsub.f32 %v226_v37, %v240_v54  ;;  %v950_v37 = vld [vmem:[#allocation8 + $0x54] sm:$0xf0]  ;;  %v866_v54 = vor.u32 %v945_v50, %v863_v53 }
 0x1bc   :  { %v878_v39 = vor.u32 %v950_v37, %v877_v36 }
 0x1bd   :  { %482 = vmatpush.bf16.msra.mxu3 %v866_v54 }
 0x1be   :  { %467 = vmatpush.bf16.msra.mxu2 %v878_v39 }
 0x1c0   :  { %v244_v55 = vpop.xlane.xlu1 %243 }
 0x1c1   :  { %v245_v57 = vmul.f32 %v244_v55, %v1352_v52  ;;  %v853_v55 = vld [vmem:[#allocation8 + $0x20] sm:$0xf] }
 0x1c2   :  { %468 = vmatpush.bf16.msra.mxu2 %v870_v45 }
 0x1c3   :  { %v247_v58 = vsub.f32 %v245_v57, %v246_v56  ;;  %v944_v56 = vld [vmem:[#allocation8 + $0x24] sm:$0xf0]  ;;  %v943_v57 = vld [vmem:[#allocation8 + $0x24] sm:$0xf] }
 0x1c4   :  { %v858_v60 = vor.u32 %v943_v57, %v855_v59  ;;  %v988_v57 = vld [vmem:[#allocation13 + $0x6] ss:$0 sm:$0xff] }
 0x1c5   :  { %v248_v61 = vmax.f32 %v247_v58, 0.0  ;;  %v854_v58 = vor.u32 %v944_v56, %v853_v55 }
 0x1c6   :  { %469 = vmatpush.bf16.msra.mxu2 %v862_v51  ;;  %483 = vmatpush.bf16.msra.mxu3 %v858_v60 }
 0x1c7   :  { %v250_v62 = vadd.f32 1e-05, %v248_v61  ;;  %v845_v61 = vld [vmem:[#allocation8 + $0x10] sm:$0xf] }
 0x1c9   :  { %1004 = vrsqrt.f32 %v250_v62  ;;  %vm257_vm8 = vweird.f32 %v250_v62 }
 0x1ca   :  { %470 = vmatpush.bf16.msra.mxu2 %v854_v58 }
 0x1cf   :  { %v1005_v63 = vpop.eup %1004 }
 0x1d0   :  { %v252_v0 = vmul.f32 %v1005_v63, %v250_v62  ;;  %vm258_vm7 = vweird.f32 %v1005_v63  ;;  %v942_v62 = vld [vmem:[#allocation8 + $0x14] sm:$0xf0] }
 0x1d1   :  { %vm259_vm9 = vmor %vm257_vm8, %vm258_vm7 }
 0x1d2   :  { %v253_v1 = vmul.f32 %v1005_v63, %v252_v0  ;;  %v846_v0 = vor.u32 %v942_v62, %v845_v61  ;;  %v989_v62 = vld [vmem:[#allocation13 + $0x7] ss:$0 sm:$0xff] }
 0x1d4   :  { %v254_v2 = vmul.f32 0.5, %v253_v1  ;;  %v847_v1 = vld [vmem:[#allocation8 + $0x18] sm:$0xf0]  ;;  %471 = vmatpush.bf16.msra.mxu2 %v846_v0 }
 0x1d6   :  { %v255_v3 = vsub.f32 1.5, %v254_v2 }
 0x1d8   :  { %v256_v4 = vmul.f32 %v1005_v63, %v255_v3  ;;  %v837_v3 = vld [vmem:[#allocation8] sm:$0xf]  ;;  %v359_v30 = vpop.permute.xlu1 %358 }
 0x1da   :  { %v260_v7 = vsel %vm259_vm9, %v1005_v63, %v256_v4  ;;  %v941_v63 = vld [vmem:[#allocation8 + $0x14] sm:$0xf]  ;;  %v940_v4 = vld [vmem:[#allocation8 + $0x4] sm:$0xf0] }
 0x1db   :  { %v261_v8 = vmul.f32 %v260_v7, %v249_v5  ;;  %v850_v2 = vor.u32 %v941_v63, %v847_v1  ;;  %v939_v5 = vld [vmem:[#allocation8 + $0x4] sm:$0xf]  ;;  %v838_v7 = vor.u32 %v940_v4, %v837_v3 }
 0x1dd   :  { %v263_v10 = vmul.f32 %v983_v6, %v261_v8  ;;  %v839_v6 = vld [vmem:[#allocation8 + $0x8] sm:$0xf0]  ;;  %484 = vmatpush.bf16.msra.mxu3 %v850_v2  ;;  %472 = vmatpush.bf16.msra.mxu2 %v838_v7 }
 0x1df   :  { %v265_v11 = vadd.f32 %v984_v9, %v263_v10  ;;  %v842_v9 = vor.u32 %v939_v5, %v839_v6 }
 0x1e1   :  { %v266_v12 = vpack.c.bf16 %v265_v11, %v265_v11  ;;  %485 = vmatpush.bf16.msra.mxu3 %v842_v9 }
 0x1e3   :  { %834 = vmatmul.msk.bf16.vlgmr.msra.gmra.mxu1 %vm229_vm5, %v266_v12 }
 0x260   :  { %v313_v17 = vpop.f32.mrf.mxu1 }
 0x261   :  { %v314_v18 = vadd.f32 %v985_v16, %v313_v17 }
 0x263   :  { %v1361_v19 = vmax.f32 %v314_v18, 0.0 }
 0x265   :  { %v320_v20 = vsel %vm229_vm5, %v1361_v19, 0.0  ;;  %v324_v21 = vmul.f32 %v1361_v19, %v1361_v19 }
 0x266   :  { %321 = vadd.xlane.f32.xlu2 %v320_v20 }
 0x267   :  { %v325_v22 = vsel %vm229_vm5, %v324_v21, 0.0 }
 0x268   :  { %v315_v23 = vpop.f32.mrf.mxu1  ;;  %326 = vadd.xlane.f32.xlu0 %v325_v22 }
 0x2d9   :  { %v322_v8 = vpop.xlane.xlu2 %321 }
 0x2da   :  { %v323_v10 = vmul.f32 %v322_v8, %v1352_v52 }
 0x2db   :  { %v327_v11 = vpop.xlane.xlu0 %326 }
 0x2dc   :  { %v329_v12 = vmul.f32 %v323_v10, %v323_v10  ;;  %v328_v13 = vmul.f32 %v327_v11, %v1352_v52  ;;  %v332_v24 = vsub.f32 %v1361_v19, %v323_v10 }
 0x2de   :  { %v330_v14 = vsub.f32 %v328_v13, %v329_v12 }
 0x2e0   :  { %v331_v15 = vmax.f32 %v330_v14, 0.0 }
 0x2e2   :  { %v333_v16 = vadd.f32 1e-05, %v331_v15 }
 0x2e4   :  { %1006 = vrsqrt.f32 %v333_v16  ;;  %vm340_vm11 = vweird.f32 %v333_v16 }
 0x2ea   :  { %v1007_v17 = vpop.eup %1006 }
 0x2eb   :  { %v335_v18 = vmul.f32 %v1007_v17, %v333_v16  ;;  %vm341_vm10 = vweird.f32 %v1007_v17 }
 0x2ec   :  { %vm342_vm12 = vmor %vm340_vm11, %vm341_vm10 }
 0x2ed   :  { %v336_v20 = vmul.f32 %v1007_v17, %v335_v18 }
 0x2ef   :  { %v337_v21 = vmul.f32 0.5, %v336_v20 }
 0x2f1   :  { %v338_v22 = vsub.f32 1.5, %v337_v21 }
 0x2f3   :  { %v339_v23 = vmul.f32 %v1007_v17, %v338_v22  ;;  %v990_v22 = vld [vmem:[#allocation13 + $0x8] ss:$0 sm:$0xff] }
 0x2f5   :  { %v343_v26 = vsel %vm342_vm12, %v1007_v17, %v339_v23  ;;  %v991_v23 = vld [vmem:[#allocation13 + $0x9] ss:$0 sm:$0xff] }
 0x2f6   :  { %v344_v27 = vmul.f32 %v343_v26, %v332_v24 }
 0x2f8   :  { %v346_v29 = vmul.f32 %v986_v25, %v344_v27 }
 0x2fa   :  { %v348_v31 = vadd.f32 %v987_v28, %v346_v29 }
 0x2fc   :  { %v361_v32 = vsel %vm229_vm5, %v348_v31, %v359_v30 }
 0x2fd   :  { %v362_v33 = vpack.c.bf16 %v361_v32, %v361_v32 }
 0x2ff   :  { %473 = vmatmul.bf16.vlgmr.msra.gmra.mxu2 %v362_v33  ;;  %486 = vmatmul.bf16.vlgmr.msra.gmra.mxu3 %v362_v33 }
 0x382   :  { %v474_v36 = vpop.f32.mrf.mxu2  ;;  %v487_v19 = vpop.f32.mrf.mxu3 }
 0x383   :  { %v488_v37 = vadd.f32 %v487_v19, %v382_v35  ;;  %v475_v41 = vadd.f32 %v474_v36, %v381_v40  ;;  %v957_v36 = vld [vmem:[#allocation10 + $0x10] sm:$0xff] }
 0x384   :  { %650 = vmatpush.bf16.msrb.mxu0 %v957_v36 }
 0x385   :  { %496 = vrot.lane.b32.xlu0 %v488_v37, %s1223_s25  ;;  %v491_v42 = vmul.f32 0.5, %v475_v41 }
 0x387   :  { %1008 = vtanh.f32 %v491_v42 }
 0x38a   :  { %v476_v38 = vpop.f32.mrf.mxu2  ;;  %v489_v39 = vpop.f32.mrf.mxu3 }
 0x38b   :  { %v955_v38 = vld [vmem:[#allocation10] sm:$0xff] }
 0x38d   :  { %v1009_v43 = vpop.eup %1008 }
 0x38e   :  { %v493_v44 = vmul.f32 0.5, %v1009_v43 }
 0x390   :  { %v494_v45 = vadd.f32 0.5, %v493_v44 }
 0x392   :  { %v502_v50 = vsub.f32 1.0, %v494_v45  ;;  %v508_v53 = vmul.f32 %v494_v45, %v359_v30 }
 0x3f7   :  { %v497_v46 = vpop.permute.xlu0 %496 }
 0x3f8   :  { %v499_v47 = vmul.f32 %v497_v46, %v494_v45 }
 0x3fa   :  { %v500_v48 = vadd.f32 %v499_v47, %v488_v37  ;;  %v956_v37 = vld [vmem:[#allocation10 + $0x8] sm:$0xff] }
 0x3fb   :  { %651 = vmatpush.bf16.msrb.mxu0 %v956_v37 }
 0x3fc   :  { %1010 = vtanh.f32 %v500_v48 }
 0x3ff   :  { %652 = vmatpush.bf16.msrb.mxu0 %v955_v38 }
 0x402   :  { %v1011_v49 = vpop.eup %1010 }
 0x403   :  { %504 = vrot.lane.b32.xlu1 %v1011_v49, %s1223_s25 }
 0x475   :  { %v505_v51 = vpop.permute.xlu1 %504 }
 0x476   :  { %v507_v54 = vmul.f32 %v505_v51, %v502_v50 }
 0x478   :  { %v509_v55 = vadd.f32 %v508_v53, %v507_v54 }
 0x47a   :  { %513 = vrot.lane.b32.xlu0 %v509_v55, %s1223_s25  ;;  %v520_v56 = vmul.f32 %v509_v55, %v509_v55 }
 0x47c   :  { %522 = vrot.lane.b32.xlu1 %v520_v56, %s1223_s25 }
 0x484   :  { %547 = vrot.lane.b32.xlu1 %v988_v57, %s1223_s25 }
 0x4ec   :  { %v1380_v58 = vpop.permute.xlu0 %513 }
 0x4ed   :  { %v516_v59 = vsel %vm229_vm5, %v1380_v58, 0.0 }
 0x4ee   :  { %517 = vadd.xlane.f32.xlu2 %v516_v59  ;;  %v523_v60 = vpop.permute.xlu1 %522 }
 0x4ef   :  { %v525_v61 = vsel %vm229_vm5, %v523_v60, 0.0 }
 0x4f0   :  { %526 = vadd.xlane.f32.xlu0 %v525_v61 }
 0x4f6   :  { %v548_v15 = vpop.permute.xlu1 %547 }
 0x504   :  { %594 = vrot.lane.b32.xlu0 %v990_v22, %s1223_s25 }
 0x506   :  { %553 = vrot.lane.b32.xlu2 %v989_v62, %s1223_s25 }
 0x50c   :  { %600 = vrot.lane.b32.xlu0 %v991_v23, %s1223_s25  ;;  %v994_v23 = vld [vmem:[#allocation13 + $0xc] ss:$0 sm:$0xff] }
 0x561   :  { %v518_v63 = vpop.xlane.xlu2 %517 }
 0x562   :  { %v519_v0 = vmul.f32 %v518_v63, %v1352_v52 }
 0x563   :  { %v527_v1 = vpop.xlane.xlu0 %526 }
 0x564   :  { %v529_v2 = vmul.f32 %v519_v0, %v519_v0  ;;  %v528_v3 = vmul.f32 %v527_v1, %v1352_v52  ;;  %v532_v13 = vsub.f32 %v509_v55, %v519_v0  ;;  %v992_v55 = vld [vmem:[#allocation13 + $0xa] ss:$0 sm:$0xff]  ;;  %v962_v0 = vld [vmem:[#allocation11 + $0x18] sm:$0xff]  ;;  %v961_v1 = vld [vmem:[#allocation11 + $0x10] sm:$0xff] }
 0x565   :  { %732 = vmatpush.bf16.msrb.mxu1 %v962_v0 }
 0x566   :  { %v530_v4 = vsub.f32 %v528_v3, %v529_v2  ;;  %v960_v2 = vld [vmem:[#allocation11 + $0x8] sm:$0xff]  ;;  %v959_v3 = vld [vmem:[#allocation11] sm:$0xff] }
 0x568   :  { %v531_v5 = vmax.f32 %v530_v4, 0.0 }
 0x569   :  { %v554_v17 = vpop.permute.xlu2 %553  ;;  %733 = vmatpush.bf16.msrb.mxu1 %v961_v1 }
 0x56a   :  { %v533_v6 = vadd.f32 1e-05, %v531_v5 }
 0x56c   :  { %1012 = vrsqrt.f32 %v533_v6  ;;  %vm540_vm14 = vweird.f32 %v533_v6 }
 0x56d   :  { %734 = vmatpush.bf16.msrb.mxu1 %v960_v2 }
 0x571   :  { %735 = vmatpush.bf16.msrb.mxu1 %v959_v3 }
 0x572   :  { %v1013_v7 = vpop.eup %1012 }
 0x573   :  { %v535_v8 = vmul.f32 %v1013_v7, %v533_v6  ;;  %vm541_vm13 = vweird.f32 %v1013_v7 }
 0x574   :  { %vm542_vm15 = vmor %vm540_vm14, %vm541_vm13 }
 0x575   :  { %v536_v9 = vmul.f32 %v1013_v7, %v535_v8 }
 0x576   :  { %v595_v42 = vpop.permute.xlu0 %594 }
 0x577   :  { %v537_v10 = vmul.f32 0.5, %v536_v9 }
 0x579   :  { %v538_v11 = vsub.f32 1.5, %v537_v10 }
 0x57b   :  { %v539_v12 = vmul.f32 %v1013_v7, %v538_v11 }
 0x57d   :  { %v543_v14 = vsel %vm542_vm15, %v1013_v7, %v539_v12 }
 0x57e   :  { %v544_v16 = vmul.f32 %v543_v14, %v532_v13  ;;  %v601_v49 = vpop.permute.xlu0 %600 }
 0x580   :  { %v550_v18 = vmul.f32 %v548_v15, %v544_v16 }
 0x582   :  { %v556_v20 = vadd.f32 %v554_v17, %v550_v18 }
 0x584   :  { %560 = vrot.lane.b32.xlu1 %v556_v20, %s1223_s25  ;;  %v567_v21 = vmul.f32 %v556_v20, %v556_v20 }
 0x58c   :  { %569 = vrot.lane.b32.xlu1 %v567_v21, %s1223_s25 }
 0x5f6   :  { %v561_v24 = vpop.permute.xlu1 %560 }
 0x5f7   :  { %v563_v25 = vsel %vm229_vm5, %v561_v24, 0.0 }
 0x5f8   :  { %564 = vadd.xlane.f32.xlu1 %v563_v25 }
 0x5fe   :  { %v570_v26 = vpop.permute.xlu1 %569 }
 0x5ff   :  { %v572_v27 = vsel %vm229_vm5, %v570_v26, 0.0 }
 0x600   :  { %573 = vadd.xlane.f32.xlu2 %v572_v27  ;;  %v995_v27 = vld [vmem:[#allocation13 + $0xd] ss:$0 sm:$0xff] }
 0x66b   :  { %v565_v28 = vpop.xlane.xlu1 %564 }
 0x66c   :  { %v566_v29 = vmul.f32 %v565_v28, %v1352_v52 }
 0x66e   :  { %v576_v31 = vmul.f32 %v566_v29, %v566_v29  ;;  %v579_v46 = vsub.f32 %v556_v20, %v566_v29  ;;  %v993_v20 = vld [vmem:[#allocation13 + $0xb] ss:$0 sm:$0xff] }
 0x673   :  { %v574_v30 = vpop.xlane.xlu2 %573 }
 0x674   :  { %v575_v32 = vmul.f32 %v574_v30, %v1352_v52 }
 0x676   :  { %v577_v33 = vsub.f32 %v575_v32, %v576_v31 }
 0x678   :  { %v578_v35 = vmax.f32 %v577_v33, 0.0 }
 0x67a   :  { %v580_v19 = vadd.f32 1e-05, %v578_v35 }
 0x67c   :  { %1014 = vrsqrt.f32 %v580_v19  ;;  %vm587_vm1 = vweird.f32 %v580_v19 }
 0x682   :  { %v1015_v39 = vpop.eup %1014 }
 0x683   :  { %v582_v40 = vmul.f32 %v1015_v39, %v580_v19  ;;  %vm588_vm0 = vweird.f32 %v1015_v39 }
 0x684   :  { %vm589_vm2 = vmor %vm587_vm1, %vm588_vm0 }
 0x685   :  { %v583_v41 = vmul.f32 %v1015_v39, %v582_v40 }
 0x687   :  { %v584_v43 = vmul.f32 0.5, %v583_v41 }
 0x689   :  { %v585_v44 = vsub.f32 1.5, %v584_v43 }
 0x68b   :  { %v586_v45 = vmul.f32 %v1015_v39, %v585_v44 }
 0x68d   :  { %v590_v47 = vsel %vm589_vm2, %v1015_v39, %v586_v45 }
 0x68e   :  { %v591_v48 = vmul.f32 %v590_v47, %v579_v46 }
 0x690   :  { %v597_v50 = vmul.f32 %v595_v42, %v591_v48 }
 0x692   :  { %v603_v51 = vadd.f32 %v601_v49, %v597_v50  ;;  %v996_v49 = vld [vmem:[#allocation13 + $0xe] ss:$0 sm:$0xff] }
 0x694   :  { %v604_v53 = vpack.c.bf16 %v603_v51, %v603_v51 }
 0x696   :  { %616 = vrot.lane.b32.xlu0 %v604_v53, %s1223_s25  ;;  %v997_v53 = vld [vmem:[#allocation13 + $0xf] ss:$0 sm:$0xff]  ;;  %s794_s25 = sshll.u32 %s1235_s10, 4  ;;  %s795_s25 = int_to_ptr.vmem [resolvable:$true] %s794_s25 }
 0x708   :  { %v617_v54 = vpop.permute.xlu0 %616 }
 0x709   :  { %915 = vmatmul.msk.bf16.vlgmr.msrb.gmra.mxu0 %vm229_vm5, %v617_v54 }
 0x786   :  { %v654_v56 = vpop.f32.mrf.mxu0 }
 0x787   :  { %v655_v57 = vadd.f32 %v992_v55, %v654_v56 }
 0x789   :  { %v658_v59 = vmax.f32 %v655_v57, 0.0 }
 0x78b   :  { %v661_v60 = vsel %vm229_vm5, %v658_v59, 0.0  ;;  %v665_v61 = vmul.f32 %v658_v59, %v658_v59 }
 0x78c   :  { %662 = vadd.xlane.f32.xlu2 %v661_v60 }
 0x78d   :  { %v666_v62 = vsel %vm229_vm5, %v665_v61, 0.0 }
 0x78e   :  { %v656_v63 = vpop.f32.mrf.mxu0  ;;  %667 = vadd.xlane.f32.xlu1 %v666_v62 }
 0x7ff   :  { %v663_v4 = vpop.xlane.xlu2 %662 }
 0x800   :  { %v664_v5 = vmul.f32 %v663_v4, %v1352_v52 }
 0x801   :  { %v668_v6 = vpop.xlane.xlu1 %667 }
 0x802   :  { %v670_v7 = vmul.f32 %v664_v5, %v664_v5  ;;  %v669_v8 = vmul.f32 %v668_v6, %v1352_v52  ;;  %v673_v18 = vsub.f32 %v658_v59, %v664_v5  ;;  %v999_v59 = vld [vmem:[#allocation13 + $0x11] ss:$0 sm:$0xff] }
 0x804   :  { %v671_v9 = vsub.f32 %v669_v8, %v670_v7 }
 0x806   :  { %v672_v10 = vmax.f32 %v671_v9, 0.0 }
 0x808   :  { %v674_v11 = vadd.f32 1e-05, %v672_v10 }
 0x80a   :  { %1016 = vrsqrt.f32 %v674_v11  ;;  %vm681_vm4 = vweird.f32 %v674_v11 }
 0x810   :  { %v1017_v12 = vpop.eup %1016 }
 0x811   :  { %v676_v13 = vmul.f32 %v1017_v12, %v674_v11  ;;  %vm682_vm3 = vweird.f32 %v1017_v12 }
 0x812   :  { %vm683_vm6 = vmor %vm681_vm4, %vm682_vm3 }
 0x813   :  { %v677_v14 = vmul.f32 %v1017_v12, %v676_v13 }
 0x815   :  { %v678_v15 = vmul.f32 0.5, %v677_v14 }
 0x817   :  { %v679_v16 = vsub.f32 1.5, %v678_v15 }
 0x819   :  { %v680_v17 = vmul.f32 %v1017_v12, %v679_v16 }
 0x81b   :  { %v684_v21 = vsel %vm683_vm6, %v1017_v12, %v680_v17 }
 0x81c   :  { %v685_v22 = vmul.f32 %v684_v21, %v673_v18 }
 0x81e   :  { %v687_v24 = vmul.f32 %v993_v20, %v685_v22 }
 0x820   :  { %v689_v25 = vadd.f32 %v994_v23, %v687_v24 }
 0x822   :  { %v690_v26 = vpack.c.bf16 %v689_v25, %v689_v25 }
 0x824   :  { %932 = vmatmul.msk.bf16.vlgmr.msrb.gmra.mxu1 %vm229_vm5, %v690_v26 }
 0x8a1   :  { %v737_v28 = vpop.f32.mrf.mxu1 }
 0x8a2   :  { %v738_v29 = vadd.f32 %v995_v27, %v737_v28 }
 0x8a4   :  { %v741_v30 = vmax.f32 %v738_v29, 0.0 }
 0x8a6   :  { %v744_v31 = vsel %vm229_vm5, %v741_v30, 0.0  ;;  %v748_v32 = vmul.f32 %v741_v30, %v741_v30 }
 0x8a7   :  { %745 = vadd.xlane.f32.xlu0 %v744_v31 }
 0x8a8   :  { %v749_v33 = vsel %vm229_vm5, %v748_v32, 0.0 }
 0x8a9   :  { %v739_v34 = vpop.f32.mrf.mxu1  ;;  %750 = vadd.xlane.f32.xlu2 %v749_v33 }
 0x91a   :  { %v746_v35 = vpop.xlane.xlu0 %745 }
 0x91b   :  { %v747_v36 = vmul.f32 %v746_v35, %v1352_v52 }
 0x91c   :  { %v751_v19 = vpop.xlane.xlu2 %750 }
 0x91d   :  { %v753_v37 = vmul.f32 %v747_v36, %v747_v36  ;;  %v752_v38 = vmul.f32 %v751_v19, %v1352_v52  ;;  %v756_v48 = vsub.f32 %v741_v30, %v747_v36  ;;  %v998_v52 = vld [vmem:[#allocation13 + $0x10] ss:$0 sm:$0xff] }
 0x91f   :  { %v754_v39 = vsub.f32 %v752_v38, %v753_v37 }
 0x921   :  { %v755_v40 = vmax.f32 %v754_v39, 0.0 }
 0x923   :  { %v757_v41 = vadd.f32 1e-05, %v755_v40 }
 0x925   :  { %1018 = vrsqrt.f32 %v757_v41  ;;  %vm764_vm8 = vweird.f32 %v757_v41 }
 0x92b   :  { %v1019_v42 = vpop.eup %1018 }
 0x92c   :  { %v759_v43 = vmul.f32 %v1019_v42, %v757_v41  ;;  %vm765_vm7 = vweird.f32 %v1019_v42 }
 0x92d   :  { %vm766_vm9 = vmor %vm764_vm8, %vm765_vm7 }
 0x92e   :  { %v760_v44 = vmul.f32 %v1019_v42, %v759_v43 }
 0x930   :  { %v761_v45 = vmul.f32 0.5, %v760_v44 }
 0x932   :  { %v762_v46 = vsub.f32 1.5, %v761_v45 }
 0x934   :  { %v763_v47 = vmul.f32 %v1019_v42, %v762_v46 }
 0x936   :  { %v767_v50 = vsel %vm766_vm9, %v1019_v42, %v763_v47 }
 0x937   :  { %v768_v51 = vmul.f32 %v767_v50, %v756_v48 }
 0x939   :  { %v770_v54 = vmul.f32 %v996_v49, %v768_v51 }
 0x93b   :  { %v772_v55 = vadd.f32 %v997_v53, %v770_v54 }
 0x93d   :  { %v775_v56 = vmul.f32 %v998_v52, %v772_v55 }
 0x93f   :  { %v776_v57 = vsel %vm229_vm5, %v775_v56, 0.0 }
 0x940   :  { %777 = vadd.xlane.f32.xlu1 %v776_v57 }
 0x9b3   :  { %v778_v60 = vpop.xlane.xlu1 %777 }
 0x9b4   :  { %v781_v61 = vadd.f32 %v999_v59, %v778_v60 }
 0x9b6   :  { %784 = vperm.xlu2 %977, %v781_v61  }
 0xa10   :  { %v785_v62 = vpop.permute.xlu2 %784 }
 0xa11   :  { %v787_v63 = vsel %vm229_vm5, %v1380_v58, %v785_v62 }
 0xa12   :  { %788 = vst [vmem:[#allocation14] sm:$0xff] %v787_v63 }
 0xa13   :  { %799 = dma.vmem_to_hbm [thread:$0]  %s795_s25, 128, %s797_s21, [#allocation4]  }
 0xa14   :  { %1220 = dma.done.wait [#allocation4], 128  }
 0xa15   :  { %1221 = vsyncadd [#allocation4], 4294967168 }
 0xa16   :  { %804 = vsyncpa [#allocation3], 1 }
 0xa17   :  { %805 = vsyncpa [#allocation6], 1 }
 0xa18   :  { %806 = vsyncpa [#allocation9], 1 }
 0xa19   :  { %807 = vsyncpa [#allocation12], 1 }
 0xa1a   :  { %808 = vsyncpa [#allocation4], 1 }

</bundles_post_ra>
